<compile_context>
chip_gen: v7x
topology: tpu7x:2x2x1
jax: 0.10.0
libtpu: 0.0.40
codegen_flags: <defaults>
</compile_context>

<pallas_src>
import jax
import jax.numpy as jnp
from jax.experimental import pallas as pl
from jax.experimental.pallas import tpu as pltpu

_LANE = 128
_PAD_PRED = -1.0e4   # finite for f16/bf16/f32; bce/ce/softplus of padding == 0


def _pick_tile_rows(R, C, itemsize):
    """Rows of 128 lanes per tile.

    Budgets double-buffered I/O *and* in-kernel f32 temporaries so the
    per-step footprint stays <= ~8 MiB (safe on v5e's 16 MiB scoped default,
    v6e's/v7x's 32 MiB scoped, v7x's 64 MiB physical VMEM)."""
    budget = 8 * 1024 * 1024
    io_per_row = 2 * _LANE * (2 * C + 1) * itemsize   # 2 bufs x (pred+gt chans + mp out)
    tmp_per_row = 12 * _LANE * 4                      # ~12 live f32 (rows,128) temporaries
    cap = max(8, budget // (io_per_row + tmp_per_row))
    if R <= cap:
        return R                                      # single tile: full-extent block is legal
    return max(8, (cap // 8) * 8)                     # aligned tile; wrapper pads R upward


def _zharkov_kernel(pred_ref, gt_ref, sums_ref, mp_ref):
    """One (sample, outer tile, inner tile) step of ZharkovLoss.

    pred_ref, gt_ref : (1, C, rows, 128) block of one sample (native dtype)
    sums_ref         : (1, 1, 8, 128) lane-partial accumulator, resident over
                       the inner tile axis.  Rows 0..3 hold per-lane partial
                       sums of: bce*pos, bce*neg_mask, ce*pos, pos.
    mp_ref           : (1, rows, 128) hard-negative map pred0*neg_mask in the
                       input dtype (softplus + top-k handled in the glue).
    """
    ti = pl.program_id(2)
    C = pred_ref.shape[1]

    # Confidence channel: upcast once, per channel (no full-block f32 copy).
    p0 = pred_ref[0, 0].astype(jnp.float32)          # (rows, 128)
    g0 = gt_ref[0, 0].astype(jnp.float32)

    # Stable BCEWithLogitsLoss(reduction='none').  log(1+exp(-|x|)) is kept
    # (instead of log1p) for Mosaic-lowering safety; exp(-|x|) <= 1 so the
    # precision difference is negligible.
    bce = jnp.maximum(p0, 0.0) - p0 * g0 + jnp.log(1.0 + jnp.exp(-jnp.abs(p0)))
    neg_mask = 1.0 - g0 + 0.001

    # Hard-negative candidate map, written raw (softplus is monotone, so top-k
    # commutes with it); dtype matches the input -> half writeback for bf16.
    mp_ref[0] = (p0 * neg_mask).astype(mp_ref.dtype)

    # Soft-target cross-entropy over class channels 1..C-1, streaming each
    # channel from VMEM: one max pass + one fused (se, tsum, tdot) pass.
    m = pred_ref[0, 1].astype(jnp.float32)
    for c in range(2, C):
        m = jnp.maximum(m, pred_ref[0, c].astype(jnp.float32))
    se = jnp.zeros_like(m)
    tsum = jnp.zeros_like(m)
    tdot = jnp.zeros_like(m)
    for c in range(1, C):
        pc = pred_ref[0, c].astype(jnp.float32)
        tc = gt_ref[0, c].astype(jnp.float32)
        se = se + jnp.exp(pc - m)
        tsum = tsum + tc
        tdot = tdot + tc * pc
    ce = (m + jnp.log(se)) * tsum - tdot             # -sum_c target_c * log_softmax_c

    def part(x):                                     # sublane-partial reduce only
        return jnp.sum(x, axis=0, keepdims=True)     # (rows,128) -> (1,128)

    blk = jnp.concatenate(
        [part(bce * g0), part(bce * neg_mask), part(ce * g0), part(g0)],
        axis=0)                                      # (4, 128)

    @pl.when(ti == 0)
    def _():
        sums_ref[...] = jnp.zeros_like(sums_ref)

    cur = sums_ref[0, 0, pl.ds(0, 4), :]
    sums_ref[0, 0, pl.ds(0, 4), :] = cur + blk


@jax.jit
def zharkov_loss(predictions, ground_truth):
    """predictions, ground_truth: NCHW arrays (B, C, H, W); C >= 2."""
    B, C, H, W = predictions.shape
    HW = H * W

    itemsize = max(jnp.dtype(predictions.dtype).itemsize,
                   jnp.dtype(ground_truth.dtype).itemsize)
    R0 = pl.cdiv(HW, _LANE)                   # rows of 128 lanes (pre row-pad)
    rows = _pick_tile_rows(R0, C, itemsize)
    T = pl.cdiv(R0, rows)                     # row-tiles per sample
    if B % 2 == 1 and T >= 2 and T % 2 == 1:
        T += 1                                # even tile count: balanced megacore split for odd B
    TO = 2 if (T >= 2 and T % 2 == 0) else 1  # outer ("parallel") tile axis
    TI = T // TO                              # inner ("arbitrary") accumulation axis
    R_pad = T * rows
    pad = R_pad * _LANE - HW

    pred_f = predictions.reshape(B, C, HW)    # contiguous reshape: no HBM copy
    gt_f = ground_truth.reshape(B, C, HW)
    if pad:
        # Neutral padding: bce/ce/pos contributions are exactly 0 and the
        # hard-negative map entries sort to the bottom (softplus == 0).
        pred_f = jnp.pad(pred_f, ((0, 0), (0, 0), (0, pad)),
                         constant_values=_PAD_PRED)
        gt_f = jnp.pad(gt_f, ((0, 0), (0, 0), (0, pad)), constant_values=0.0)
    pred_r = pred_f.reshape(B, C, R_pad, _LANE)
    gt_r = gt_f.reshape(B, C, R_pad, _LANE)

    io_spec = pl.BlockSpec((1, C, rows, _LANE),
                           lambda b, to, ti: (b, 0, to * TI + ti, 0))
    # TODO(synk): if profiling ever shows exposed DMA on v5e, sweep
    # pipeline_mode=pl.Buffered(3) on the two input specs.
    sums, mp = pl.pallas_call(
        _zharkov_kernel,
        grid=(B, TO, TI),
        in_specs=[io_spec, io_spec],
        out_specs=(
            pl.BlockSpec((1, 1, 8, _LANE), lambda b, to, ti: (b, to, 0, 0)),
            pl.BlockSpec((1, rows, _LANE),
                         lambda b, to, ti: (b, to * TI + ti, 0)),
        ),
        out_shape=(
            jax.ShapeDtypeStruct((B, TO, 8, _LANE), jnp.float32),
            jax.ShapeDtypeStruct((B, R_pad, _LANE), predictions.dtype),
        ),
        compiler_params=pltpu.CompilerParams(
            dimension_semantics=("parallel", "parallel", "arbitrary"),
            vmem_limit_bytes=32 * 1024 * 1024),
    )(pred_r, gt_r)

    stats = jnp.sum(sums, axis=(1, 3))        # (B, 8): finish the lane reduce in glue
    bce_pos = jnp.sum(stats[:, 0])
    bce_neg = jnp.sum(stats[:, 1])
    ce_pos = jnp.sum(stats[:, 2])
    pos_b = stats[:, 3]                       # per-sample positive counts
    pos_total = jnp.sum(pos_b)

    non_zero = pos_total + 0.001
    neg_sum = 1.001 * (B * H * W) - pos_total  # == sum(1 - g0 + 0.001), pad-free
    Lp = 15.0 * bce_pos / non_zero
    Ln = bce_neg / neg_sum
    Lc = ce_pos / non_zero

    # Hard-negative term: per-sample top-k of pred0*neg_mask, then softplus.
    # TODO(synk): torch.topk with data-dependent k has no clean static Pallas
    # equivalent; selection uses an XLA sort + index mask.  An in-kernel
    # two-pass threshold/histogram over mp would remove the O(B*HW log HW)
    # sort and the HBM round-trip of the map if this glue ever dominates.
    mp_sorted = -jnp.sort(-mp.reshape(B, R_pad * _LANE), axis=-1)  # descending
    vals = mp_sorted.astype(jnp.float32)
    sp_sorted = jnp.maximum(vals, 0.0) + jnp.log1p(jnp.exp(-jnp.abs(vals)))
    k = jnp.floor(pos_b).astype(jnp.int32)    # matches tensor.sum().int()
    idx = jnp.arange(R_pad * _LANE, dtype=jnp.int32)[None, :]
    mask = (idx < k[:, None]).astype(jnp.float32)
    lh_b = jnp.where(
        k > 0,
        jnp.sum(sp_sorted * mask, axis=-1)
        / jnp.maximum(k, 1).astype(jnp.float32),
        0.0)
    Lh = 5.0 * jnp.sum(lh_b) / B

    return Lp + Ln + Lh + Lc


def zharkov_loss_ref(pred, gt):
    """Pure-JAX mirror of the PyTorch forward (for verification)."""
    p0, g0 = pred[:, 0], gt[:, 0]
    bce = jnp.maximum(p0, 0.0) - p0 * g0 + jnp.log(1.0 + jnp.exp(-jnp.abs(p0)))
    non_zero = g0.sum() + 0.001
    Lp = 15.0 * (bce * g0).sum() / non_zero
    neg_mask = 1.0 - g0 + 0.001
    Ln = (bce * neg_mask).sum() / neg_mask.sum()

    B, H, W = p0.shape
    mp = (p0 * neg_mask).reshape(B, -1)
    srt = -jnp.sort(-mp, axis=-1)
    sp = jnp.maximum(srt, 0.0) + jnp.log1p(jnp.exp(-jnp.abs(srt)))
    k = jnp.floor(g0.reshape(B, -1).sum(-1)).astype(jnp.int32)
    mask = (jnp.arange(H * W)[None, :] < k[:, None]).astype(jnp.float32)
    lh_b = jnp.where(k > 0, (sp * mask).sum(-1) / jnp.maximum(k, 1), 0.0)
    Lh = 5.0 * lh_b.sum() / B

    logits, tgt = pred[:, 1:], gt[:, 1:]
    lse = jax.scipy.special.logsumexp(logits, axis=1)
    ce = lse * tgt.sum(axis=1) - (tgt * logits).sum(axis=1)
    Lc = (ce * g0).sum() / non_zero
    return Lp + Ln + Lh + Lc


if __name__ == "__main__":
    key = jax.random.PRNGKey(0)
    k1, k2, k3 = jax.random.split(key, 3)
    B, C, H, W = 2, 4, 16, 16

    predictions = jax.random.normal(k1, (B, C, H, W), dtype=jnp.float32)
    pos_mask = (jax.random.uniform(k2, (B, H, W)) < 0.3).astype(jnp.float32)
    cls = jax.random.randint(k3, (B, H, W), 0, C - 1)
    onehot = jnp.transpose(jax.nn.one_hot(cls, C - 1, dtype=jnp.float32),
                           (0, 3, 1, 2))
    ground_truth = jnp.concatenate([pos_mask[:, None], onehot], axis=1)

    loss = jax.block_until_ready(zharkov_loss(predictions, ground_truth))
    ref = zharkov_loss_ref(predictions, ground_truth)
    assert jnp.allclose(loss, ref, rtol=2e-2, atol=2e-3), (float(loss), float(ref))
    print("KERNEL_OK")
</pallas_src>

<mosaic_0001>
module attributes {stable_mosaic.version = 11 : i64} {
  func.func @_zharkov_kernel(%arg0: i32, %arg1: i32, %arg2: i32, %arg3: memref<1x4x2x128xf32, #tpu.memory_space<vmem>>, %arg4: memref<1x4x2x128xf32, #tpu.memory_space<vmem>>, %arg5: memref<1x1x8x128xf32, #tpu.memory_space<vmem>>, %arg6: memref<1x2x128xf32, #tpu.memory_space<vmem>>) attributes {dimension_semantics = [#tpu.dimension_semantics<parallel>, #tpu.dimension_semantics<parallel>, #tpu.dimension_semantics<arbitrary>], iteration_bounds = array<i64: 2, 1, 1>, scalar_prefetch = 0 : i64, scratch_operands = 0 : i64, tpu.core_type = #tpu.core_type<tc>, window_params = [{transform_indices = @transform_0, window_bounds = array<i64: 1, 4, 2, 128>}, {transform_indices = @transform_1, window_bounds = array<i64: 1, 4, 2, 128>}, {transform_indices = @transform_2, window_bounds = array<i64: 1, 1, 8, 128>}, {transform_indices = @transform_3, window_bounds = array<i64: 1, 2, 128>}]} {
    %c0 = arith.constant 0 : index
    %c0_0 = arith.constant 0 : index
    %c0_1 = arith.constant 0 : index
    %c0_2 = arith.constant 0 : index
    %0 = vector.load %arg3[%c0, %c0_0, %c0_1, %c0_2] : memref<1x4x2x128xf32, #tpu.memory_space<vmem>>, vector<1x1x2x128xf32>
    %1 = vector.shape_cast %0 : vector<1x1x2x128xf32> to vector<2x128xf32>
    %c0_3 = arith.constant 0 : index
    %c0_4 = arith.constant 0 : index
    %c0_5 = arith.constant 0 : index
    %c0_6 = arith.constant 0 : index
    %2 = vector.load %arg4[%c0_3, %c0_4, %c0_5, %c0_6] : memref<1x4x2x128xf32, #tpu.memory_space<vmem>>, vector<1x1x2x128xf32>
    %3 = vector.shape_cast %2 : vector<1x1x2x128xf32> to vector<2x128xf32>
    %cst = arith.constant 0.000000e+00 : f32
    %4 = vector.broadcast %cst : f32 to vector<2x128xf32>
    %5 = arith.maximumf %1, %4 : vector<2x128xf32>
    %6 = arith.mulf %1, %3 : vector<2x128xf32>
    %7 = arith.subf %5, %6 : vector<2x128xf32>
    %8 = math.absf %1 : vector<2x128xf32>
    %cst_7 = arith.constant 0.000000e+00 : f32
    %9 = vector.broadcast %cst_7 : f32 to vector<2x128xf32>
    %10 = arith.subf %9, %8 : vector<2x128xf32>
    %11 = math.exp %10 : vector<2x128xf32>
    %cst_8 = arith.constant 1.000000e+00 : f32
    %12 = vector.broadcast %cst_8 : f32 to vector<2x128xf32>
    %13 = arith.addf %12, %11 : vector<2x128xf32>
    %14 = math.log %13 : vector<2x128xf32>
    %15 = arith.addf %7, %14 : vector<2x128xf32>
    %cst_9 = arith.constant 1.000000e+00 : f32
    %16 = vector.broadcast %cst_9 : f32 to vector<2x128xf32>
    %17 = arith.subf %16, %3 : vector<2x128xf32>
    %cst_10 = arith.constant 1.000000e-03 : f32
    %18 = vector.broadcast %cst_10 : f32 to vector<2x128xf32>
    %19 = arith.addf %17, %18 : vector<2x128xf32>
    %20 = arith.mulf %1, %19 : vector<2x128xf32>
    %c0_11 = arith.constant 0 : index
    %c0_12 = arith.constant 0 : index
    %c0_13 = arith.constant 0 : index
    %21 = vector.load %arg6[%c0_11, %c0_12, %c0_13] : memref<1x2x128xf32, #tpu.memory_space<vmem>>, vector<1x2x128xf32>
    %22 = vector.shape_cast %21 : vector<1x2x128xf32> to vector<2x128xf32>
    %23 = vector.shape_cast %20 : vector<2x128xf32> to vector<1x2x128xf32>
    tpu.vector_store %arg6[%c0_11, %c0_12, %c0_13], %23 {strides = array<i32>} : memref<1x2x128xf32, #tpu.memory_space<vmem>>, vector<1x2x128xf32>,
    %c0_14 = arith.constant 0 : index
    %c1 = arith.constant 1 : index
    %c0_15 = arith.constant 0 : index
    %c0_16 = arith.constant 0 : index
    %24 = vector.load %arg3[%c0_14, %c1, %c0_15, %c0_16] : memref<1x4x2x128xf32, #tpu.memory_space<vmem>>, vector<1x1x2x128xf32>
    %25 = vector.shape_cast %24 : vector<1x1x2x128xf32> to vector<2x128xf32>
    %c0_17 = arith.constant 0 : index
    %c2 = arith.constant 2 : index
    %c0_18 = arith.constant 0 : index
    %c0_19 = arith.constant 0 : index
    %26 = vector.load %arg3[%c0_17, %c2, %c0_18, %c0_19] : memref<1x4x2x128xf32, #tpu.memory_space<vmem>>, vector<1x1x2x128xf32>
    %27 = vector.shape_cast %26 : vector<1x1x2x128xf32> to vector<2x128xf32>
    %28 = arith.maximumf %25, %27 : vector<2x128xf32>
    %c0_20 = arith.constant 0 : index
    %c3 = arith.constant 3 : index
    %c0_21 = arith.constant 0 : index
    %c0_22 = arith.constant 0 : index
    %29 = vector.load %arg3[%c0_20, %c3, %c0_21, %c0_22] : memref<1x4x2x128xf32, #tpu.memory_space<vmem>>, vector<1x1x2x128xf32>
    %30 = vector.shape_cast %29 : vector<1x1x2x128xf32> to vector<2x128xf32>
    %31 = arith.maximumf %28, %30 : vector<2x128xf32>
    %cst_23 = arith.constant 0.000000e+00 : f32
    %32 = vector.broadcast %cst_23 : f32 to vector<2x128xf32>
    %cst_24 = arith.constant 0.000000e+00 : f32
    %33 = vector.broadcast %cst_24 : f32 to vector<2x128xf32>
    %cst_25 = arith.constant 0.000000e+00 : f32
    %34 = vector.broadcast %cst_25 : f32 to vector<2x128xf32>
    %c0_26 = arith.constant 0 : index
    %c1_27 = arith.constant 1 : index
    %c0_28 = arith.constant 0 : index
    %c0_29 = arith.constant 0 : index
    %35 = vector.load %arg3[%c0_26, %c1_27, %c0_28, %c0_29] : memref<1x4x2x128xf32, #tpu.memory_space<vmem>>, vector<1x1x2x128xf32>
    %36 = vector.shape_cast %35 : vector<1x1x2x128xf32> to vector<2x128xf32>
    %c0_30 = arith.constant 0 : index
    %c1_31 = arith.constant 1 : index
    %c0_32 = arith.constant 0 : index
    %c0_33 = arith.constant 0 : index
    %37 = vector.load %arg4[%c0_30, %c1_31, %c0_32, %c0_33] : memref<1x4x2x128xf32, #tpu.memory_space<vmem>>, vector<1x1x2x128xf32>
    %38 = vector.shape_cast %37 : vector<1x1x2x128xf32> to vector<2x128xf32>
    %39 = arith.subf %36, %31 : vector<2x128xf32>
    %40 = math.exp %39 : vector<2x128xf32>
    %41 = arith.addf %32, %40 : vector<2x128xf32>
    %42 = arith.addf %33, %38 : vector<2x128xf32>
    %43 = arith.mulf %38, %36 : vector<2x128xf32>
    %44 = arith.addf %34, %43 : vector<2x128xf32>
    %c0_34 = arith.constant 0 : index
    %c2_35 = arith.constant 2 : index
    %c0_36 = arith.constant 0 : index
    %c0_37 = arith.constant 0 : index
    %45 = vector.load %arg3[%c0_34, %c2_35, %c0_36, %c0_37] : memref<1x4x2x128xf32, #tpu.memory_space<vmem>>, vector<1x1x2x128xf32>
    %46 = vector.shape_cast %45 : vector<1x1x2x128xf32> to vector<2x128xf32>
    %c0_38 = arith.constant 0 : index
    %c2_39 = arith.constant 2 : index
    %c0_40 = arith.constant 0 : index
    %c0_41 = arith.constant 0 : index
    %47 = vector.load %arg4[%c0_38, %c2_39, %c0_40, %c0_41] : memref<1x4x2x128xf32, #tpu.memory_space<vmem>>, vector<1x1x2x128xf32>
    %48 = vector.shape_cast %47 : vector<1x1x2x128xf32> to vector<2x128xf32>
    %49 = arith.subf %46, %31 : vector<2x128xf32>
    %50 = math.exp %49 : vector<2x128xf32>
    %51 = arith.addf %41, %50 : vector<2x128xf32>
    %52 = arith.addf %42, %48 : vector<2x128xf32>
    %53 = arith.mulf %48, %46 : vector<2x128xf32>
    %54 = arith.addf %44, %53 : vector<2x128xf32>
    %c0_42 = arith.constant 0 : index
    %c3_43 = arith.constant 3 : index
    %c0_44 = arith.constant 0 : index
    %c0_45 = arith.constant 0 : index
    %55 = vector.load %arg3[%c0_42, %c3_43, %c0_44, %c0_45] : memref<1x4x2x128xf32, #tpu.memory_space<vmem>>, vector<1x1x2x128xf32>
    %56 = vector.shape_cast %55 : vector<1x1x2x128xf32> to vector<2x128xf32>
    %c0_46 = arith.constant 0 : index
    %c3_47 = arith.constant 3 : index
    %c0_48 = arith.constant 0 : index
    %c0_49 = arith.constant 0 : index
    %57 = vector.load %arg4[%c0_46, %c3_47, %c0_48, %c0_49] : memref<1x4x2x128xf32, #tpu.memory_space<vmem>>, vector<1x1x2x128xf32>
    %58 = vector.shape_cast %57 : vector<1x1x2x128xf32> to vector<2x128xf32>
    %59 = arith.subf %56, %31 : vector<2x128xf32>
    %60 = math.exp %59 : vector<2x128xf32>
    %61 = arith.addf %51, %60 : vector<2x128xf32>
    %62 = arith.addf %52, %58 : vector<2x128xf32>
    %63 = arith.mulf %58, %56 : vector<2x128xf32>
    %64 = arith.addf %54, %63 : vector<2x128xf32>
    %65 = math.log %61 : vector<2x128xf32>
    %66 = arith.addf %31, %65 : vector<2x128xf32>
    %67 = arith.mulf %66, %62 : vector<2x128xf32>
    %68 = arith.subf %67, %64 : vector<2x128xf32>
    %69 = arith.mulf %15, %3 : vector<2x128xf32>
    %cst_50 = arith.constant dense<0.000000e+00> : vector<128xf32>
    %70 = vector.multi_reduction <add>, %69, %cst_50 [0] : vector<2x128xf32> to vector<128xf32>
    %71 = vector.shape_cast %70 : vector<128xf32> to vector<1x128xf32>
    %72 = arith.mulf %15, %19 : vector<2x128xf32>
    %cst_51 = arith.constant dense<0.000000e+00> : vector<128xf32>
    %73 = vector.multi_reduction <add>, %72, %cst_51 [0] : vector<2x128xf32> to vector<128xf32>
    %74 = vector.shape_cast %73 : vector<128xf32> to vector<1x128xf32>
    %75 = arith.mulf %68, %3 : vector<2x128xf32>
    %cst_52 = arith.constant dense<0.000000e+00> : vector<128xf32>
    %76 = vector.multi_reduction <add>, %75, %cst_52 [0] : vector<2x128xf32> to vector<128xf32>
    %77 = vector.shape_cast %76 : vector<128xf32> to vector<1x128xf32>
    %cst_53 = arith.constant dense<0.000000e+00> : vector<128xf32>
    %78 = vector.multi_reduction <add>, %3, %cst_53 [0] : vector<2x128xf32> to vector<128xf32>
    %79 = vector.shape_cast %78 : vector<128xf32> to vector<1x128xf32>
    %80 = tpu.concatenate %71, %74, %77, %79 in 0 : vector<1x128xf32>, vector<1x128xf32>, vector<1x128xf32>, vector<1x128xf32> -> vector<4x128xf32>
    %c0_i32 = arith.constant 0 : i32
    %81 = arith.cmpi eq, %arg2, %c0_i32 : i32
    %82 = arith.extui %81 : i1 to i32
    %c0_i32_54 = arith.constant 0 : i32
    %83 = arith.cmpi ne, %82, %c0_i32_54 : i32
    scf.if %83 {
      %cst_63 = arith.constant 0.000000e+00 : f32
      %90 = vector.broadcast %cst_63 : f32 to vector<1x1x8x128xf32>
      %c0_64 = arith.constant 0 : index
      %c0_65 = arith.constant 0 : index
      %c0_66 = arith.constant 0 : index
      %c0_67 = arith.constant 0 : index
      %91 = vector.load %arg5[%c0_64, %c0_65, %c0_66, %c0_67] : memref<1x1x8x128xf32, #tpu.memory_space<vmem>>, vector<1x1x8x128xf32>
      tpu.vector_store %arg5[%c0_64, %c0_65, %c0_66, %c0_67], %90 {strides = array<i32>} : memref<1x1x8x128xf32, #tpu.memory_space<vmem>>, vector<1x1x8x128xf32>,
    } else {
    }
    %c0_55 = arith.constant 0 : index
    %c0_56 = arith.constant 0 : index
    %c0_57 = arith.constant 0 : index
    %c0_58 = arith.constant 0 : index
    %84 = vector.load %arg5[%c0_55, %c0_56, %c0_57, %c0_58] : memref<1x1x8x128xf32, #tpu.memory_space<vmem>>, vector<1x1x4x128xf32>
    %85 = vector.shape_cast %84 : vector<1x1x4x128xf32> to vector<4x128xf32>
    %86 = arith.addf %85, %80 : vector<4x128xf32>
    %c0_59 = arith.constant 0 : index
    %c0_60 = arith.constant 0 : index
    %c0_61 = arith.constant 0 : index
    %c0_62 = arith.constant 0 : index
    %87 = vector.load %arg5[%c0_59, %c0_60, %c0_61, %c0_62] : memref<1x1x8x128xf32, #tpu.memory_space<vmem>>, vector<1x1x4x128xf32>
    %88 = vector.shape_cast %87 : vector<1x1x4x128xf32> to vector<4x128xf32>
    %89 = vector.shape_cast %86 : vector<4x128xf32> to vector<1x1x4x128xf32>
    tpu.vector_store %arg5[%c0_59, %c0_60, %c0_61, %c0_62], %89 {strides = array<i32>} : memref<1x1x8x128xf32, #tpu.memory_space<vmem>>, vector<1x1x4x128xf32>,
    return
  }
  func.func @transform_0(%arg0: i32, %arg1: i32, %arg2: i32) -> (i32, i32, i32, i32) {
    %c1_i32 = arith.constant 1 : i32
    %0 = arith.muli %arg1, %c1_i32 : i32
    %1 = arith.addi %0, %arg2 : i32
    %c0_i32 = arith.constant 0 : i32
    %c0_i32_0 = arith.constant 0 : i32
    %c0_i32_1 = arith.constant 0 : i32
    return %arg0, %c0_i32, %1, %c0_i32_0 : i32, i32, i32, i32
  }
  func.func @transform_1(%arg0: i32, %arg1: i32, %arg2: i32) -> (i32, i32, i32, i32) {
    %c1_i32 = arith.constant 1 : i32
    %0 = arith.muli %arg1, %c1_i32 : i32
    %1 = arith.addi %0, %arg2 : i32
    %c0_i32 = arith.constant 0 : i32
    %c0_i32_0 = arith.constant 0 : i32
    %c0_i32_1 = arith.constant 0 : i32
    return %arg0, %c0_i32, %1, %c0_i32_0 : i32, i32, i32, i32
  }
  func.func @transform_2(%arg0: i32, %arg1: i32, %arg2: i32) -> (i32, i32, i32, i32) {
    %c0_i32 = arith.constant 0 : i32
    %c0_i32_0 = arith.constant 0 : i32
    %c0_i32_1 = arith.constant 0 : i32
    return %arg0, %arg1, %c0_i32, %c0_i32_0 : i32, i32, i32, i32
  }
  func.func @transform_3(%arg0: i32, %arg1: i32, %arg2: i32) -> (i32, i32, i32) {
    %c1_i32 = arith.constant 1 : i32
    %0 = arith.muli %arg1, %c1_i32 : i32
    %1 = arith.addi %0, %arg2 : i32
    %c0_i32 = arith.constant 0 : i32
    %c0_i32_0 = arith.constant 0 : i32
    return %arg0, %1, %c0_i32 : i32, i32, i32
  }
}

</mosaic_0001>

<bundles_post_ra>
// kernel: zharkov_loss.1
= control target key start
LH: loop header
LB: loop body
LE: loop exit
PB: predicated region body
PF: predicated region fallthrough
CT: control target
= control target key end

     0   :  { %s624_s12 = smov 0   ;;  %s626_s13 = smov 0   ;;  %s679_s0 = inlined_call_operand.vmem [shape: f32[2,4,2,128], index: 0, kind: input, shape index: {}]   ;;  %s680_s1 = inlined_call_operand.vmem [shape: f32[2,4,2,128], index: 1, kind: input, shape index: {}]   ;;  %s681_s2 = inlined_call_operand.vmem [shape: f32[2,1,8,128], index: 2, kind: output, shape index: {0}]   ;;  %s682_s3 = inlined_call_operand.vmem [shape: f32[2,2,128], index: 3, kind: output, shape index: {1}]  }
   0x1   :  { %s628_s14 = smov 0  }
   0x2 LB: > { %s33_s15 = sadd.s32 1, %s597_s13  ;;  %p525_p0 = scmp.ge.s32.totalorder %s601_s14, 1  ;;  %s601_s14 = sphi %s628_s14, %s14_s14   ;;  %s597_s13 = sphi %s626_s13, %s684_s13   ;;  %s593_s12 = sphi %s624_s12, %s683_s12  }
   0x3   : > { %p35_p1 = scmp.ge.s32.totalorder %s33_s15, 2  ;;  %p193_p2 = scmp.lt.s32.totalorder %s601_s14, 3 }
   0x5   : > { %s686_s15 = smov (%p35_p1, %s33_s15), 0  ;;  %p194_p3 = pnand %p525_p0, %p193_p2 }
   0x6   : > { %p241_p4 = scmp.lt.s32.totalorder (!%p194_p3), %s593_s12, 1  ;;  %v603_v4 = vmov (!%p194_p3), 0.0   ;;  %vm334_vm0 = vcmask (!%p194_p3), 1041408   ;;  %vm365_vm1 = vcmask (!%p194_p3), 1040384   ;;  %vm368_vm2 = vcmask (!%p194_p3), 1042432  }
   0x7   : > { %197 = sbr.rel (%p194_p3) target bundleno = 81 (0x51), region = 28 }
   0xe   : > { %s688_s12 = smov (!%p241_p4, %s593_s12), 1 }
   0xf   : > { %s540_s16 = sshll.u32 %s688_s12, 3  ;;  %s531_s26 = sshll.u32 %s688_s12, 1 }
  0x10   : > { %s248_s19 = scalar_lea.vmem %s679_s0, %s540_s16  ;;  %s648_s22 = scalar_lea.vmem %s680_s1, %s540_s16 }
  0x11   : > { %s653_s25 = scalar_lea.vmem %s681_s2, %s540_s16  ;;  %v532_v0 = vld [vmem:[%s248_s19 + $0x2] sm:$0x3]  ;;  %v533_v1 = vld [vmem:[%s248_s19 + $0x4] sm:$0x3]  ;;  %v534_v2 = vld [vmem:[%s248_s19 + $0x6] sm:$0x3]  ;;  %s274_s29 = scalar_lea.vmem %s682_s3, %s531_s26 }
  0x12   : > { %v297_v3 = vmax.f32 %v532_v0, %v533_v1  ;;  %374 = vst [vmem:[%s653_s25] sm:$0xff] %v603_v4  ;;  %v276_v5 = vld [vmem:[%s248_s19] sm:$0x3]  ;;  %v535_v27 = vld [vmem:[%s648_s22 + $0x2] sm:$0x3]  ;;  %v536_v28 = vld [vmem:[%s648_s22 + $0x4] sm:$0x3] }
  0x13   : > { %v277_v7 = vld [vmem:[%s648_s22] sm:$0x3]  ;;  %v281_v8 = vand.u32 2147483647, %v276_v5  ;;  %v308_v29 = vmul.f32 %v535_v27, %v532_v0  ;;  %v317_v30 = vmul.f32 %v536_v28, %v533_v1  ;;  %v537_v31 = vld [vmem:[%s648_s22 + $0x6] sm:$0x3]  ;;  %v316_v34 = vadd.f32 %v536_v28, %v535_v27 }
  0x14   : > { %v300_v6 = vmax.f32 %v297_v3, %v534_v2  ;;  %v289_v9 = vsub.f32 1.0, %v277_v7  ;;  %v278_v32 = vmax.f32 %v276_v5, 0.0  ;;  %v279_v33 = vmul.f32 %v277_v7, %v276_v5 }
  0x15   : > { %v282_v13 = vsub.f32 0.0, %v281_v8  ;;  %v358_v35 = vsel %vm334_vm0, %v277_v7, 0.0  ;;  %v318_v36 = vadd.f32 %v317_v30, %v308_v29  ;;  %v326_v37 = vmul.f32 %v537_v31, %v534_v2 }
  0x16   : > { %v303_v10 = vsub.f32 %v532_v0, %v300_v6  ;;  %v312_v11 = vsub.f32 %v533_v1, %v300_v6  ;;  %v321_v12 = vsub.f32 %v534_v2, %v300_v6  ;;  %v290_v14 = vadd.f32 0.001, %v289_v9 }
  0x17   : > { %v283_v18 = vmul.f32 1.442695, %v282_v13  ;;  %v280_v39 = vsub.f32 %v278_v32, %v279_v33  ;;  %v325_v41 = vadd.f32 %v537_v31, %v316_v34  ;;  %v359_v43 = vrot.slane %v358_v35, 4 }
  0x18   : > { %v304_v15 = vmul.f32 1.442695, %v303_v10  ;;  %v313_v16 = vmul.f32 1.442695, %v312_v11  ;;  %v322_v17 = vmul.f32 1.442695, %v321_v12  ;;  %v291_v19 = vmul.f32 %v290_v14, %v276_v5 }
  0x19   : > { %v327_v45 = vadd.f32 %v326_v37, %v318_v36  ;;  %v360_v49 = vadd.f32 %v359_v43, %v358_v35 }
  0x1a   : > { %567 = vpow2.f32 %v304_v15  ;;  %292 = vst [vmem:[%s274_s29] sm:$0x3] %v291_v19 }
  0x1b   : > { %569 = vpow2.f32 %v313_v16  ;;  %v361_v58 = vrot.slane %v360_v49, 2  ;;  %v375_v16 = vld [vmem:[%s653_s25] sm:$0xf] }
  0x1c   : > { %571 = vpow2.f32 %v322_v17 }
  0x1d   : > { %573 = vpow2.f32 %v283_v18  ;;  %v362_v1 = vadd.f32 %v361_v58, %v360_v49 }
  0x1f   : > { %v363_v9 = vrot.slane %v362_v1, 1 }
  0x21   : > { %v364_v13 = vadd.f32 %v363_v9, %v362_v1 }
  0x24   : > { %v568_v20 = vpop.eup %567 }
  0x25   : > { %v570_v21 = vpop.eup %569 }
  0x26   : > { %v572_v22 = vpop.eup %571  ;;  %v315_v23 = vadd.f32 %v570_v21, %v568_v20 }
  0x27   : > { %v574_v24 = vpop.eup %573 }
  0x28   : > { %v324_v25 = vadd.f32 %v572_v22, %v315_v23  ;;  %v285_v26 = vadd.f32 1.0, %v574_v24 }
  0x2a   : > { %575 = vlog2.f32 %v324_v25 }
  0x2b   : > { %577 = vlog2.f32 %v285_v26 }
  0x34   : > { %v576_v38 = vpop.eup %575 }
  0x35   : > { %v578_v40 = vpop.eup %577  ;;  %v329_v42 = vmul.f32 0.6931472, %v576_v38 }
  0x36   : > { %v287_v44 = vmul.f32 0.6931472, %v578_v40 }
  0x37   : > { %v330_v46 = vadd.f32 %v329_v42, %v300_v6 }
  0x38   : > { %v288_v47 = vadd.f32 %v287_v44, %v280_v39 }
  0x39   : > { %v331_v48 = vmul.f32 %v330_v46, %v325_v41 }
  0x3a   : > { %v333_v50 = vmul.f32 %v288_v47, %v277_v7  ;;  %v342_v51 = vmul.f32 %v290_v14, %v288_v47 }
  0x3b   : > { %v332_v52 = vsub.f32 %v331_v48, %v327_v45 }
  0x3c   : > { %v335_v53 = vsel %vm334_vm0, %v333_v50, 0.0  ;;  %v343_v54 = vsel %vm334_vm0, %v342_v51, 0.0 }
  0x3d   : > { %v336_v55 = vrot.slane %v335_v53, 4  ;;  %v344_v56 = vrot.slane %v343_v54, 4  ;;  %v350_v57 = vmul.f32 %v332_v52, %v277_v7 }
  0x3f   : > { %v337_v59 = vadd.f32 %v336_v55, %v335_v53  ;;  %v345_v60 = vadd.f32 %v344_v56, %v343_v54  ;;  %v351_v61 = vsel %vm334_vm0, %v350_v57, 0.0 }
  0x40   : > { %v352_v62 = vrot.slane %v351_v61, 4 }
  0x41   : > { %v338_v63 = vrot.slane %v337_v59, 2  ;;  %v346_v0 = vrot.slane %v345_v60, 2 }
  0x42   : > { %v353_v2 = vadd.f32 %v352_v62, %v351_v61 }
  0x43   : > { %v339_v3 = vadd.f32 %v338_v63, %v337_v59  ;;  %v347_v4 = vadd.f32 %v346_v0, %v345_v60 }
  0x44   : > { %v354_v5 = vrot.slane %v353_v2, 2 }
  0x45   : > { %v348_v6 = vrot.slane %v347_v4, 1  ;;  %v340_v8 = vrot.slane %v339_v3, 1 }
  0x46   : > { %v355_v10 = vadd.f32 %v354_v5, %v353_v2 }
  0x47   : > { %v349_v7 = vadd.f32 %v348_v6, %v347_v4  ;;  %v341_v11 = vadd.f32 %v340_v8, %v339_v3 }
  0x48   : > { %v356_v12 = vrot.slane %v355_v10, 1 }
  0x49   : > { %v366_v14 = vsel %vm365_vm1, %v341_v11, %v349_v7 }
  0x4a   : > { %v357_v15 = vadd.f32 %v356_v12, %v355_v10 }
  0x4c   : > { %v367_v17 = vsel %vm334_vm0, %v366_v14, %v357_v15 }
  0x4d   : > { %v369_v18 = vsel %vm368_vm2, %v367_v17, %v364_v13 }
  0x4e   : > { %v376_v19 = vadd.f32 %v375_v16, %v369_v18 }
  0x50   : > { %377 = vst [vmem:[%s653_s25] sm:$0xf] %v376_v19 }
  0x51 PF: > { %s14_s14 = sadd.s32 1, %s601_s14   ;;  %s683_s12 = smov %s597_s13 }
  0x52   : > { %p11_p5 = scmp.ge.s32.totalorder %s14_s14, 4   ;;  %s684_s13 = smov %s686_s15 }
  0x54   :  { %13 = sbr.rel (!%p11_p5) target bundleno = 2 (0x2), region = 83 }

</bundles_post_ra>
